<compile_context>
chip_gen: v6e
topology: v6e:2x2x1
jax: 0.10.0
libtpu: 0.0.40
codegen_flags: <defaults>
</compile_context>

<pallas_src>
import numpy as np

import jax
import jax.numpy as jnp
from jax.experimental import pallas as pl
from jax.experimental.pallas import tpu as pltpu

ALPHA = 3.0

# Contract the last axis of the LHS with the last axis of the RHS (lane axes):
# no operand transposes / relayouts, weights stay in native [out, in] layout.
_CONTRACT_LAST = (((1,), (1,)), ((), ()))


def _gc_tail(e1, e2, w1_ref, w2_ref, b_ref, o_ref):
    """Shared tail: linear + tanh layers, fused antisymmetric product, output."""
    b1 = b_ref[0:1, :]                                           # [1, H]
    b2 = b_ref[1:2, :]                                           # [1, H]
    v1 = jnp.tanh(ALPHA * (
        jax.lax.dot_general(e1, w1_ref[...], _CONTRACT_LAST,
                            preferred_element_type=jnp.float32) + b1))
    v2 = jnp.tanh(ALPHA * (
        jax.lax.dot_general(e2, w2_ref[...], _CONTRACT_LAST,
                            preferred_element_type=jnp.float32) + b2))

    # Fused antisymmetric similarity: [v1, -v2] @ [v2, v1]^T == v1@v2.T - v2@v1.T
    # One MXU product with K = 2H instead of two with K = H plus a VPU subtract.
    lhs = jnp.concatenate([v1, -v2], axis=-1)                    # [N, 2H]
    rhs = jnp.concatenate([v2, v1], axis=-1)                     # [N, 2H]
    a = jax.lax.dot_general(lhs, rhs, _CONTRACT_LAST,
                            preferred_element_type=jnp.float32)  # [N, N]

    # relu(tanh(alpha * a))
    o_ref[...] = jnp.maximum(jnp.tanh(ALPHA * a), 0.0)


def _gc_kernel_gather(idx_ref, embcat_ref, w1_ref, w2_ref, b_ref, o_ref):
    """General path: in-kernel one-hot gather fused into one MXU matmul."""
    n = idx_ref.shape[0]
    num_nodes, two_e = embcat_ref.shape
    emb_dim = two_e // 2

    # One-hot row selection on the MXU (exact: single 1.0 per row, f32 acc).
    # Note: out-of-range / negative idx yields an all-zero row (unlike the
    # PyTorch nn.Embedding which would raise) — fine for valid inputs.
    cols = jax.lax.broadcasted_iota(jnp.int32, (n, num_nodes), 1)
    onehot = jnp.where(idx_ref[...] == cols, 1.0, 0.0)           # [N, num_nodes]
    ecat = jnp.dot(onehot, embcat_ref[...],
                   preferred_element_type=jnp.float32)           # [N, 2*emb_dim]

    _gc_tail(ecat[:, :emb_dim], ecat[:, emb_dim:], w1_ref, w2_ref, b_ref, o_ref)


def _gc_kernel_identity(emb1_ref, emb2_ref, w1_ref, w2_ref, b_ref, o_ref):
    """Fast path: idx == arange(num_nodes) -> the gather is the identity."""
    _gc_tail(emb1_ref[...], emb2_ref[...], w1_ref, w2_ref, b_ref, o_ref)


_VSPEC = pl.BlockSpec(memory_space=pltpu.VMEM)


@jax.jit
def _gc_forward_identity(emb1_w, emb2_w, w1, w2, b):
    n = emb1_w.shape[0]
    return pl.pallas_call(
        _gc_kernel_identity,
        out_shape=jax.ShapeDtypeStruct((n, n), jnp.float32),
        in_specs=[_VSPEC] * 5,
        out_specs=_VSPEC,
    )(emb1_w, emb2_w, w1, w2, b)


@jax.jit
def _gc_forward_gather(idx2d, emb1_w, emb2_w, w1, w2, b):
    n = idx2d.shape[0]
    # Concatenate the two embedding tables so the in-kernel gather is a single
    # onehot @ emb_cat MXU matmul (one RHS, weight-stationary, one fewer DMA).
    emb_cat = jnp.concatenate([emb1_w, emb2_w], axis=-1)         # [num_nodes, 2E]
    return pl.pallas_call(
        _gc_kernel_gather,
        out_shape=jax.ShapeDtypeStruct((n, n), jnp.float32),
        in_specs=[_VSPEC] * 5,
        out_specs=_VSPEC,
    )(idx2d, emb_cat, w1, w2, b)


def gc_forward(emb1_w, emb2_w, lin1_w, lin1_b, lin2_w, lin2_b, idx):
    """GCModule forward.

    emb1_w/emb2_w: [num_nodes, emb_dim]          (nn.Embedding weights)
    lin1_w/lin2_w: [out_features, in_features]   (nn.Linear weights, native layout)
    lin1_b/lin2_b: [out_features]
    idx:           [N] integer node indices (concrete array; Python dispatcher)
    returns adj:   [N, N] float32
    """
    assert lin1_w.shape[0] == lin2_w.shape[0], "lin1_out must equal lin2_out for a - a.T"
    assert lin1_w.shape[1] == emb1_w.shape[1] and lin2_w.shape[1] == emb2_w.shape[1]

    emb1_w = jnp.asarray(emb1_w, jnp.float32)
    emb2_w = jnp.asarray(emb2_w, jnp.float32)
    w1 = jnp.asarray(lin1_w, jnp.float32)                        # [out, in] (no transpose)
    w2 = jnp.asarray(lin2_w, jnp.float32)
    b = jnp.stack([jnp.asarray(lin1_b, jnp.float32),
                   jnp.asarray(lin2_b, jnp.float32)])            # [2, H] single bias input

    num_nodes = emb1_w.shape[0]
    idx_np = np.asarray(idx)

    # Fast path for the module's standard usage (idx = arange(num_nodes)):
    # the embedding gather is the identity, skip the one-hot entirely.
    if (idx_np.ndim == 1 and idx_np.shape[0] == num_nodes
            and np.array_equal(idx_np, np.arange(num_nodes))):
        return _gc_forward_identity(emb1_w, emb2_w, w1, w2, b)

    idx2d = jnp.asarray(idx_np, jnp.int32).reshape(-1, 1)        # [N, 1] for in-kernel one-hot
    return _gc_forward_gather(idx2d, emb1_w, emb2_w, w1, w2, b)


def _reference(emb1_w, emb2_w, lin1_w, lin1_b, lin2_w, lin2_b, idx):
    e1 = jnp.take(emb1_w, idx, axis=0)
    e2 = jnp.take(emb2_w, idx, axis=0)
    v1 = jnp.tanh(ALPHA * (e1 @ lin1_w.T + lin1_b))
    v2 = jnp.tanh(ALPHA * (e2 @ lin2_w.T + lin2_b))
    a = v1 @ v2.T - v2 @ v1.T
    return jax.nn.relu(jnp.tanh(ALPHA * a))


if __name__ == "__main__":
    # Small shapes consistent with the module: num_nodes=16, emb_dim=32,
    # lin1: 32->32, lin2: 32->32, alpha=3.
    num_nodes = 16
    emb_dim = 32
    lin_out = 32

    key = jax.random.PRNGKey(0)
    k1, k2, k3, k4, k5, k6, k7 = jax.random.split(key, 7)

    emb1_w = jax.random.normal(k1, (num_nodes, emb_dim), jnp.float32)
    emb2_w = jax.random.normal(k2, (num_nodes, emb_dim), jnp.float32)
    lin1_w = jax.random.normal(k3, (lin_out, emb_dim), jnp.float32) * 0.1
    lin1_b = jax.random.normal(k4, (lin_out,), jnp.float32) * 0.1
    lin2_w = jax.random.normal(k5, (lin_out, emb_dim), jnp.float32) * 0.1
    lin2_b = jax.random.normal(k6, (lin_out,), jnp.float32) * 0.1

    # Tolerance: the fused K=2H antisymmetric product changes accumulation
    # order, so the diagonal / near-zero entries of `a` differ from the
    # reference by a few f32 ulps (per review correctness note).
    ATOL = RTOL = 2e-5

    # Module's standard usage: idx = arange(num_nodes) -> identity fast path.
    idx = jnp.arange(num_nodes, dtype=jnp.int32)
    adj = jax.block_until_ready(
        gc_forward(emb1_w, emb2_w, lin1_w, lin1_b, lin2_w, lin2_b, idx))
    ref = _reference(emb1_w, emb2_w, lin1_w, lin1_b, lin2_w, lin2_b, idx)
    assert adj.shape == (num_nodes, num_nodes)
    assert jnp.allclose(adj, ref, atol=ATOL, rtol=RTOL)

    # Also exercise the fused in-kernel gather with a non-identity permutation.
    perm = jax.random.permutation(k7, num_nodes).astype(jnp.int32)
    adj_p = jax.block_until_ready(
        gc_forward(emb1_w, emb2_w, lin1_w, lin1_b, lin2_w, lin2_b, perm))
    ref_p = _reference(emb1_w, emb2_w, lin1_w, lin1_b, lin2_w, lin2_b, perm)
    assert jnp.allclose(adj_p, ref_p, atol=ATOL, rtol=RTOL)

    print("KERNEL_OK")
</pallas_src>

<mosaic_0001>
module attributes {stable_mosaic.version = 11 : i64} {
  func.func @_gc_kernel_identity(%arg0: memref<16x32xf32, #tpu.memory_space<vmem>>, %arg1: memref<16x32xf32, #tpu.memory_space<vmem>>, %arg2: memref<32x32xf32, #tpu.memory_space<vmem>>, %arg3: memref<32x32xf32, #tpu.memory_space<vmem>>, %arg4: memref<2x32xf32, #tpu.memory_space<vmem>>, %arg5: memref<16x16xf32, #tpu.memory_space<vmem>>) attributes {dimension_semantics = [], scalar_prefetch = 0 : i64, scratch_operands = 0 : i64, tpu.core_type = #tpu.core_type<tc>} {
    %c0 = arith.constant 0 : index
    %c0_0 = arith.constant 0 : index
    %0 = vector.load %arg0[%c0, %c0_0] : memref<16x32xf32, #tpu.memory_space<vmem>>, vector<16x32xf32>
    %c0_1 = arith.constant 0 : index
    %c0_2 = arith.constant 0 : index
    %1 = vector.load %arg1[%c0_1, %c0_2] : memref<16x32xf32, #tpu.memory_space<vmem>>, vector<16x32xf32>
    %c0_3 = arith.constant 0 : index
    %c0_4 = arith.constant 0 : index
    %2 = vector.load %arg4[%c0_3, %c0_4] : memref<2x32xf32, #tpu.memory_space<vmem>>, vector<1x32xf32>
    %c1 = arith.constant 1 : index
    %c0_5 = arith.constant 0 : index
    %3 = vector.load %arg4[%c1, %c0_5] : memref<2x32xf32, #tpu.memory_space<vmem>>, vector<1x32xf32>
    %c0_6 = arith.constant 0 : index
    %c0_7 = arith.constant 0 : index
    %4 = vector.load %arg2[%c0_6, %c0_7] : memref<32x32xf32, #tpu.memory_space<vmem>>, vector<32x32xf32>
    %cst = arith.constant dense<0.000000e+00> : vector<16x32xf32>
    %5 = tpu.matmul %0, %4, %cst {dimension_numbers = #tpu.dot_dimension_numbers<[1], [1], [0], [0], [0, 0, 1, 0], [], []>} : vector<16x32xf32>, vector<32x32xf32>, vector<16x32xf32> -> vector<16x32xf32>
    %6 = vector.broadcast %2 : vector<1x32xf32> to vector<16x32xf32>
    %7 = arith.addf %5, %6 : vector<16x32xf32>
    %cst_8 = arith.constant 3.000000e+00 : f32
    %8 = vector.broadcast %cst_8 : f32 to vector<16x32xf32>
    %9 = arith.mulf %8, %7 : vector<16x32xf32>
    %10 = math.tanh %9 : vector<16x32xf32>
    %c0_9 = arith.constant 0 : index
    %c0_10 = arith.constant 0 : index
    %11 = vector.load %arg3[%c0_9, %c0_10] : memref<32x32xf32, #tpu.memory_space<vmem>>, vector<32x32xf32>
    %cst_11 = arith.constant dense<0.000000e+00> : vector<16x32xf32>
    %12 = tpu.matmul %1, %11, %cst_11 {dimension_numbers = #tpu.dot_dimension_numbers<[1], [1], [0], [0], [0, 0, 1, 0], [], []>} : vector<16x32xf32>, vector<32x32xf32>, vector<16x32xf32> -> vector<16x32xf32>
    %13 = vector.broadcast %3 : vector<1x32xf32> to vector<16x32xf32>
    %14 = arith.addf %12, %13 : vector<16x32xf32>
    %cst_12 = arith.constant 3.000000e+00 : f32
    %15 = vector.broadcast %cst_12 : f32 to vector<16x32xf32>
    %16 = arith.mulf %15, %14 : vector<16x32xf32>
    %17 = math.tanh %16 : vector<16x32xf32>
    %cst_13 = arith.constant 0.000000e+00 : f32
    %18 = vector.broadcast %cst_13 : f32 to vector<16x32xf32>
    %19 = arith.subf %18, %17 : vector<16x32xf32>
    %20 = tpu.concatenate %10, %19 in 1 : vector<16x32xf32>, vector<16x32xf32> -> vector<16x64xf32>
    %21 = tpu.concatenate %17, %10 in 1 : vector<16x32xf32>, vector<16x32xf32> -> vector<16x64xf32>
    %cst_14 = arith.constant dense<0.000000e+00> : vector<16x16xf32>
    %22 = tpu.matmul %20, %21, %cst_14 {dimension_numbers = #tpu.dot_dimension_numbers<[1], [1], [0], [0], [0, 0, 1, 0], [], []>} : vector<16x64xf32>, vector<16x64xf32>, vector<16x16xf32> -> vector<16x16xf32>
    %cst_15 = arith.constant 3.000000e+00 : f32
    %23 = vector.broadcast %cst_15 : f32 to vector<16x16xf32>
    %24 = arith.mulf %23, %22 : vector<16x16xf32>
    %25 = math.tanh %24 : vector<16x16xf32>
    %cst_16 = arith.constant 0.000000e+00 : f32
    %26 = vector.broadcast %cst_16 : f32 to vector<16x16xf32>
    %27 = arith.maximumf %25, %26 : vector<16x16xf32>
    %c0_17 = arith.constant 0 : index
    %c0_18 = arith.constant 0 : index
    %28 = vector.load %arg5[%c0_17, %c0_18] : memref<16x16xf32, #tpu.memory_space<vmem>>, vector<16x16xf32>
    tpu.vector_store %arg5[%c0_17, %c0_18], %27 {strides = array<i32>} : memref<16x16xf32, #tpu.memory_space<vmem>>, vector<16x16xf32>,
    return
  }
}

</mosaic_0001>

<bundles_post_ra>
// kernel: _gc_forward_identity.1
= control target key start
LH: loop header
LB: loop body
LE: loop exit
PB: predicated region body
PF: predicated region fallthrough
CT: control target
= control target key end

     0   :  { %10 = vsyncpa [#allocation3], 0  ;;  %s720_s0 = inlined_call_operand.hbm [shape: f32[16,32], index: 0, kind: input, shape index: {}]   ;;  %s721_s1 = inlined_call_operand.hbm [shape: f32[16,32], index: 1, kind: input, shape index: {}]   ;;  %s722_s2 = inlined_call_operand.hbm [shape: f32[32,32], index: 2, kind: input, shape index: {}]   ;;  %s723_s3 = inlined_call_operand.hbm [shape: f32[32,32], index: 3, kind: input, shape index: {}]   ;;  %s724_s4 = inlined_call_operand.vmem [shape: f32[2,32], index: 4, kind: input, shape index: {}]   ;;  %s725_s5 = inlined_call_operand.hbm [shape: f32[16,16], index: 5, kind: output, shape index: {}]  }
   0x1   :  { %11 = vsyncpa [#allocation6], 0 }
   0x2   :  { %12 = vsyncpa [#allocation9], 0 }
   0x3   :  { %13 = vsyncpa [#allocation4], 0  ;;  %s622_s18 = smov [#allocation5]   ;;  %s623_s20 = smov [#allocation2]  }
   0x4   :  { %s31_s19 = sshll.u32 %s622_s18, 4  ;;  %s19_s21 = sshll.u32 %s623_s20, 4  ;;  %s32_s19 = int_to_ptr.vmem [resolvable:$true] %s31_s19  ;;  %s20_s21 = int_to_ptr.vmem [resolvable:$true] %s19_s21 }
   0x5   :  { %s522_s22 = scalar_lea.vmem %s32_s19, 256  ;;  %p527_p1 = scmp.lt.s32.totalorder %s32_s19, %s32_s19 }
   0x6   :  { %p523_p0 = scmp.ne.s32.totalorder %s32_s19, %s522_s22  ;;  %p528_p2 = scmp.lt.s32.totalorder %s522_s22, %s522_s22 }
   0x8   :  { %p529_p3 = por %p528_p2, %p527_p1 }
   0xa   :  { %p530_p4 = pnand %p529_p3, %p523_p0 }
   0xc   :  { %533 = shalt.err (!%p530_p4)
}
   0xd   :  { %s624_s23 = smov 128   ;;  %s625_s24 = smov 8  }
   0xe   :  { %37 = dma.hbm_to_vmem [thread:$0]  %s721_s1, 256, %s32_s19, [#allocation6], %s624_s23, %s624_s23, %s625_s24  }
   0xf   :  { %s542_s27 = scalar_lea.vmem %s20_s21, 256  ;;  %p547_p6 = scmp.lt.s32.totalorder %s20_s21, %s20_s21 }
  0x10   :  { %p543_p5 = scmp.ne.s32.totalorder %s20_s21, %s542_s27  ;;  %p548_p7 = scmp.lt.s32.totalorder %s542_s27, %s542_s27 }
  0x12   :  { %p549_p8 = por %p548_p7, %p547_p6 }
  0x14   :  { %p550_p9 = pnand %p549_p8, %p543_p5 }
  0x16   :  { %553 = shalt.err (!%p550_p9)
}
  0x17   :  { %25 = dma.hbm_to_vmem [thread:$0]  %s720_s0, 256, %s20_s21, [#allocation3], %s624_s23, %s624_s23, %s625_s24  }
  0x18   :  { %s626_s30 = smov [#allocation7]   ;;  %s627_s7 = smov [#allocation8]  }
  0x19   :  { %s43_s6 = sshll.u32 %s626_s30, 4  ;;  %s55_s8 = sshll.u32 %s627_s7, 4  ;;  %s44_s6 = int_to_ptr.vmem [resolvable:$true] %s43_s6  ;;  %s56_s8 = int_to_ptr.vmem [resolvable:$true] %s55_s8 }
  0x1a   :  { %s562_s1 = scalar_lea.vmem %s44_s6, 512  ;;  %p567_p11 = scmp.lt.s32.totalorder %s44_s6, %s44_s6 }
  0x1b   :  { %p563_p10 = scmp.ne.s32.totalorder %s44_s6, %s562_s1  ;;  %p568_p12 = scmp.lt.s32.totalorder %s562_s1, %s562_s1 }
  0x1d   :  { %p569_p13 = por %p568_p12, %p567_p11 }
  0x1f   :  { %p570_p0 = pnand %p569_p13, %p563_p10 }
  0x21   :  { %573 = shalt.err (!%p570_p0)
}
  0x22   :  { %49 = dma.hbm_to_vmem [thread:$0]  %s722_s2, 512, %s44_s6, [#allocation6], %s624_s23, %s624_s23, %s625_s24  }
  0x23   :  { %s582_s0 = scalar_lea.vmem %s56_s8, 512  ;;  %p587_p2 = scmp.lt.s32.totalorder %s56_s8, %s56_s8 }
  0x24   :  { %p583_p1 = scmp.ne.s32.totalorder %s56_s8, %s582_s0  ;;  %p588_p3 = scmp.lt.s32.totalorder %s582_s0, %s582_s0 }
  0x26   :  { %p589_p4 = por %p588_p3, %p587_p2 }
  0x28   :  { %p590_p5 = pnand %p589_p4, %p583_p1 }
  0x2a   :  { %593 = shalt.err (!%p590_p5)
}
  0x2b   :  { %61 = dma.hbm_to_vmem [thread:$0]  %s723_s3, 512, %s56_s8, [#allocation9], %s624_s23, %s624_s23, %s625_s24  }
  0x2c   :  { %614 = dma.done.wait [#allocation3], 256  }
  0x2d   :  { %615 = vsyncadd [#allocation3], 4294967040 }
  0x2e   :  { %616 = dma.done.wait [#allocation6], 768  }
  0x2f   :  { %617 = vsyncadd [#allocation6], 4294966528 }
  0x30   :  { %618 = dma.done.wait [#allocation9], 512  }
  0x31   :  { %619 = vsyncadd [#allocation9], 4294966784  ;;  %vm90_vm0 = vcmask 261120   ;;  %v85_v0 = vld [vmem:[#allocation7 + $0x18] sm:$0xff]  ;;  %v84_v2 = vld [vmem:[#allocation7 + $0x10] sm:$0xff]  ;;  %s628_s15 = smov 32  }
  0x32   :  { %v191_v1 = vld [vmem:[#allocation8 + $0x18] sm:$0xff]  ;;  %465 = vmatprep.subr.msk.mxu0 %vm90_vm0, %v85_v0  ;;  %v190_v3 = vld [vmem:[#allocation8 + $0x10] sm:$0xff]  ;;  %v76_v4 = vld [vmem:[#allocation2] sm:$0xff]  ;;  %vm315_vm1 = vcmask 523264   ;;  %vm409_vm2 = vcmask 130048  }
  0x33   :  { %476 = vmatprep.subr.msk.mxu1 %vm90_vm0, %v191_v1  ;;  %466 = vmatpush3.xpose.msk.msra.mxu0 %vm90_vm0, %v85_v0  ;;  %v78_v5 = vld [vmem:[#allocation5] sm:$0xff]  ;;  %v83_v6 = vld [vmem:[#allocation7 + $0x8] sm:$0xff]  ;;  %v82_v8 = vld [vmem:[#allocation7] sm:$0xff] }
  0x34   :  { %477 = vmatpush3.xpose.msk.msra.mxu1 %vm90_vm0, %v191_v1  ;;  %467 = vmatprep.subr.msk.mxu0 %vm90_vm0, %v84_v2  ;;  %v189_v7 = vld [vmem:[#allocation8 + $0x8] sm:$0xff]  ;;  %v188_v9 = vld [vmem:[#allocation8] sm:$0xff]  ;;  %v79_v11 = vld [vmem:[#allocation5 + $0x8] sm:$0xff] }
  0x35   :  { %478 = vmatprep.subr.msk.mxu1 %vm90_vm0, %v190_v3  ;;  %473 = vmatprep.mubr.msk.f32.mxu0 %vm90_vm0, %v76_v4  ;;  %v77_v10 = vld [vmem:[#allocation2 + $0x8] sm:$0xff]  ;;  %v431_v12 = vld [vmem:[%s724_s4] ss:$0 sm:$0xff]  ;;  %v438_v13 = vld [vmem:[%s724_s4 + $0x1] ss:$0 sm:$0xff]  ;;  %s629_s4 = smov [#allocation10]  }
  0x36   :  { %484 = vmatprep.mubr.msk.f32.mxu1 %vm90_vm0, %v78_v5  ;;  %s417_s16 = sshll.u32 %s629_s4, 4  ;;  %s418_s16 = int_to_ptr.vmem [resolvable:$true] %s417_s16 }
  0x37   :  { %468 = vmatpush3.xpose.msk.msra.mxu0 %vm90_vm0, %v84_v2  ;;  %s594_s17 = scalar_lea.vmem %s418_s16, 256  ;;  %p599_p7 = scmp.lt.s32.totalorder %s418_s16, %s418_s16 }
  0x38   :  { %479 = vmatpush3.xpose.msk.msra.mxu1 %vm90_vm0, %v190_v3  ;;  %469 = vmatprep.subr.msk.mxu0 %vm90_vm0, %v83_v6  ;;  %p595_p6 = scmp.ne.s32.totalorder %s418_s16, %s594_s17  ;;  %p600_p8 = scmp.lt.s32.totalorder %s594_s17, %s594_s17 }
  0x39   :  { %480 = vmatprep.subr.msk.mxu1 %vm90_vm0, %v189_v7 }
  0x3a   :  { %p601_p9 = por %p600_p8, %p599_p7 }
  0x3b   :  { %470 = vmatpush3.xpose.msk.msra.mxu0 %vm90_vm0, %v83_v6 }
  0x3c   :  { %481 = vmatpush3.xpose.msk.msra.mxu1 %vm90_vm0, %v189_v7  ;;  %471 = vmatprep.subr.msk.mxu0 %vm90_vm0, %v82_v8  ;;  %p602_p10 = pnand %p601_p9, %p595_p6 }
  0x3d   :  { %482 = vmatprep.subr.msk.mxu1 %vm90_vm0, %v188_v9 }
  0x3f   :  { %472 = vmatpush3.xpose.msk.msra.mxu0 %vm90_vm0, %v82_v8 }
  0x40   :  { %483 = vmatpush3.xpose.msk.msra.mxu1 %vm90_vm0, %v188_v9 }
  0x42   :  { %474 = vmatmul.mubr.msk.f32.vlgmr.msra.gmra.mxu0 %vm90_vm0, %v77_v10 }
  0x43   :  { %485 = vmatmul.mubr.msk.f32.vlgmr.msra.gmra.mxu1 %vm90_vm0, %v79_v11 }
 0x102   :  { %v475_v14 = vpop.f32.mrf.mxu0 }
 0x103   :  { %v486_v15 = vpop.f32.mrf.mxu1  ;;  %v181_v16 = vadd.f32 %v475_v14, %v431_v12 }
 0x104   :  { %v286_v17 = vadd.f32 %v486_v15, %v438_v13  ;;  %v175_v18 = vpop.f32.mrf.mxu0 }
 0x105   :  { %v280_v19 = vpop.f32.mrf.mxu1  ;;  %v185_v20 = vmul.f32 3.0, %v181_v16  ;;  %v176_v21 = vadd.f32 %v431_v12, %v175_v18 }
 0x106   :  { %v281_v22 = vadd.f32 %v438_v13, %v280_v19  ;;  %v290_v25 = vmul.f32 3.0, %v286_v17 }
 0x107   :  { %502 = vtanh.f32 %v185_v20  ;;  %v184_v23 = vmul.f32 3.0, %v176_v21 }
 0x108   :  { %v289_v24 = vmul.f32 3.0, %v281_v22 }
 0x10a   :  { %504 = vtanh.f32 %v289_v24 }
 0x10b   :  { %506 = vtanh.f32 %v184_v23 }
 0x10c   :  { %508 = vtanh.f32 %v290_v25 }
 0x114   :  { %v503_v26 = vpop.eup %502 }
 0x115   :  { %309 = vrot.lane.b32.xlu0 %v503_v26, %s628_s15 }
 0x117   :  { %v505_v27 = vpop.eup %504 }
 0x118   :  { %v507_v28 = vpop.eup %506  ;;  %v293_v29 = vsub.f32 0.0, %v505_v27 }
 0x119   :  { %v509_v30 = vpop.eup %508  ;;  %307 = vrot.lane.b32.xlu0 %v507_v28, %s628_s15 }
 0x11a   :  { %297 = vrot.lane.b32.xlu1 %v293_v29, %s628_s15  ;;  %v294_v31 = vsub.f32 0.0, %v509_v30 }
 0x11e   :  { %299 = vrot.lane.b32.xlu1 %v294_v31, %s628_s15 }
 0x187   :  { %v310_v32 = vpop.permute.xlu0 %309 }
 0x188   :  { %v314_v33 = vsel %vm90_vm0, %v509_v30, %v310_v32 }
 0x189   :  { %487 = vmatprep.subr.msk.mxu0 %vm315_vm1, %v314_v33 }
 0x18a   :  { %488 = vmatpush3.xpose.msk.msra.mxu0 %vm315_vm1, %v314_v33 }
 0x18b   :  { %v308_v34 = vpop.permute.xlu0 %307 }
 0x18c   :  { %v298_v35 = vpop.permute.xlu1 %297  ;;  %v313_v36 = vsel %vm90_vm0, %v505_v27, %v308_v34 }
 0x18d   :  { %v303_v37 = vsel %vm90_vm0, %v507_v28, %v298_v35  ;;  %489 = vmatprep.subr.msk.mxu0 %vm315_vm1, %v313_v36 }
 0x18e   :  { %491 = vmatprep.mubr.msk.f32.mxu0 %vm315_vm1, %v303_v37  ;;  %490 = vmatpush3.xpose.msk.msra.mxu0 %vm315_vm1, %v313_v36 }
 0x190   :  { %v300_v38 = vpop.permute.xlu1 %299 }
 0x191   :  { %v304_v39 = vsel %vm90_vm0, %v503_v26, %v300_v38 }
 0x192   :  { %492 = vmatmul.mubr.msk.f32.vlgmr.msra.gmra.mxu0 %vm315_vm1, %v304_v39 }
 0x252   :  { %v493_v40 = vpop.f32.mrf.mxu0 }
 0x253   :  { %v404_v41 = vmul.f32 3.0, %v493_v40 }
 0x254   :  { %v394_v42 = vpop.f32.mrf.mxu0 }
 0x255   :  { %510 = vtanh.f32 %v404_v41  ;;  %v403_v43 = vmul.f32 3.0, %v394_v42 }
 0x257   :  { %512 = vtanh.f32 %v403_v43 }
 0x262   :  { %v511_v44 = vpop.eup %510 }
 0x263   :  { %v408_v45 = vmax.f32 %v511_v44, 0.0 }
 0x264   :  { %v513_v46 = vpop.eup %512 }
 0x265   :  { %v407_v47 = vmax.f32 %v513_v46, 0.0  ;;  %411 = vst.msk [vmem:[#allocation10 + $0x8] sm:$0xff] %vm409_vm2, %v408_v45 }
 0x267   :  { %410 = vst.msk [vmem:[#allocation10] sm:$0xff] %vm409_vm2, %v407_v47 }
 0x268   :  { %605 = shalt.err (!%p602_p10)
}
 0x269   :  { %423 = dma.vmem_to_hbm [thread:$0]  %s418_s16, 256, %s725_s5, [#allocation4], %s624_s23, %s624_s23, %s625_s24  }
 0x26a   :  { %620 = dma.done.wait [#allocation4], 256  }
 0x26b   :  { %621 = vsyncadd [#allocation4], 4294967040 }
 0x26c   :  { %427 = vsyncpa [#allocation3], 1 }
 0x26d   :  { %428 = vsyncpa [#allocation6], 1 }
 0x26e   :  { %429 = vsyncpa [#allocation9], 1 }
 0x26f   :  { %430 = vsyncpa [#allocation4], 1 }

</bundles_post_ra>
